<compile_context>
chip_gen: v7x
topology: tpu7x:2x2x1
jax: 0.10.0
libtpu: 0.0.40
codegen_flags: <defaults>
</compile_context>

<pallas_src>
import functools

import jax
import jax.numpy as jnp
from jax.experimental import pallas as pl
from jax.experimental.pallas import tpu as pltpu

BN_EPS = 1e-5
LN_EPS = 1e-5


def _round_up(x, m):
    return ((x + m - 1) // m) * m


def _stem_kernel(p_ref, w_ref, prm_ref, o_ref, *, e_true):
    # p_ref: (TM, K_pad) bf16, w_ref: (K_pad, E_pad) bf16, prm_ref: (4, E_pad) f32
    y = jnp.dot(p_ref[...], w_ref[...], preferred_element_type=jnp.float32)

    prm = prm_ref[...]                    # (4, E_pad) f32, resident
    bn_scale = prm[0:1, :]
    bn_shift = prm[1:2, :]
    ln_gamma = prm[2:3, :]
    ln_beta = prm[3:4, :]

    # fused BatchNorm2d (inference affine) + ReLU.  Padded lanes have
    # scale = shift = 0, so they stay exactly 0 after this.
    y = jnp.maximum(y * bn_scale + bn_shift, 0.0)

    # LayerNorm over the true e_true channels only (padded lanes masked).
    inv_e = 1.0 / float(e_true)
    lane = jax.lax.broadcasted_iota(jnp.int32, y.shape, 1)
    valid = lane < e_true
    mean = jnp.sum(y, axis=-1, keepdims=True) * inv_e      # padded lanes are 0
    c = jnp.where(valid, y - mean, 0.0)
    var = jnp.sum(c * c, axis=-1, keepdims=True) * inv_e
    yn = c * jax.lax.rsqrt(var + LN_EPS)
    o_ref[...] = yn * ln_gamma + ln_beta


@functools.partial(jax.jit, static_argnames=("patch_size",))
def simple_stem_forward(x, conv_w, bn_gamma, bn_beta, bn_mean, bn_var,
                        ln_gamma, ln_beta, *, patch_size):
    """x: (B, C, H, W) NCHW.  Returns (B, num_patches, embed_dim) float32."""
    B, C, H, W = x.shape
    p = patch_size
    E = conv_w.shape[0]
    Hp, Wp = H // p, W // p
    num_patches = Hp * Wp
    K = C * p * p
    N = B * num_patches

    # ---- padded / tiled dimensions -------------------------------------
    K_pad = _round_up(K, 128)                 # lane-aligned contraction
    E_pad = _round_up(E, 128)                 # lane-dense output
    TM = min(512, _round_up(N, 8))            # large row tile, multiple of 8
    N_pad = _round_up(N, TM)                  # no remainder rows dropped
    n_steps = N_pad // TM

    # ---- glue (XLA): patchify.  Cast to bf16 BEFORE the transpose so the
    # HBM copy produced by the 6-D transpose moves half the bytes. ---------
    xb = x.astype(jnp.bfloat16)
    patches = xb.reshape(B, C, Hp, p, Wp, p).transpose(0, 2, 4, 1, 3, 5)
    patches = patches.reshape(N, K)
    patches = jnp.pad(patches, ((0, N_pad - N), (0, K_pad - K)))

    # conv weight (E, C, p, p) -> (K, E), zero-padded, bf16
    w_mat = conv_w.reshape(E, K).T.astype(jnp.bfloat16)
    w_mat = jnp.pad(w_mat, ((0, K_pad - K), (0, E_pad - E)))

    # fold BatchNorm2d (eval mode, running stats) into per-channel affine.
    # TODO(synk): training-mode BatchNorm (batch statistics) is not implemented.
    bn_scale = bn_gamma * jax.lax.rsqrt(bn_var + BN_EPS)
    bn_shift = bn_beta - bn_mean * bn_scale
    params = jnp.stack([bn_scale, bn_shift, ln_gamma, ln_beta]).astype(jnp.float32)
    params = jnp.pad(params, ((0, 0), (0, E_pad - E)))          # (4, E_pad)

    # VMEM budget: double-buffered row/out tiles + resident weight + params,
    # with 2x headroom; cap well under v7x's 64 MiB physical VMEM.
    vmem_bytes = (2 * TM * K_pad * 2 + 2 * TM * E_pad * 4
                  + 2 * K_pad * E_pad * 2 + 2 * 4 * E_pad * 4)
    vmem_limit = int(min(max(2 * vmem_bytes, 8 << 20), 48 << 20))

    kernel = functools.partial(_stem_kernel, e_true=E)
    out = pl.pallas_call(
        kernel,
        out_shape=jax.ShapeDtypeStruct((N_pad, E_pad), jnp.float32),
        grid_spec=pltpu.PrefetchScalarGridSpec(
            num_scalar_prefetch=0,
            grid=(n_steps,),
            in_specs=[
                pl.BlockSpec((TM, K_pad), lambda i: (i, 0)),      # patch rows
                pl.BlockSpec((K_pad, E_pad), lambda i: (0, 0)),   # weight (resident)
                pl.BlockSpec((4, E_pad), lambda i: (0, 0)),       # stacked params
            ],
            out_specs=pl.BlockSpec((TM, E_pad), lambda i: (i, 0)),
        ),
        compiler_params=pltpu.CompilerParams(
            dimension_semantics=(("parallel",) if n_steps > 1 else ("arbitrary",)),
            vmem_limit_bytes=vmem_limit),
    )(patches, w_mat, params)

    out = out[:N, :E]
    return out.reshape(B, num_patches, E)


def _reference(x, conv_w, bn_gamma, bn_beta, bn_mean, bn_var,
               ln_gamma, ln_beta, patch_size):
    # pure-JAX reference for correctness check (f32 math)
    y = jax.lax.conv_general_dilated(
        x, conv_w, window_strides=(patch_size, patch_size), padding="VALID",
        dimension_numbers=("NCHW", "OIHW", "NCHW"),
        precision=jax.lax.Precision.HIGHEST)
    scale = bn_gamma * jax.lax.rsqrt(bn_var + BN_EPS)
    y = y * scale[None, :, None, None] + (bn_beta - bn_mean * scale)[None, :, None, None]
    y = jnp.maximum(y, 0.0)
    B, E, Hp, Wp = y.shape
    y = y.reshape(B, E, Hp * Wp).transpose(0, 2, 1)  # (B, P, E)
    mean = jnp.mean(y, axis=-1, keepdims=True)
    var = jnp.mean((y - mean) ** 2, axis=-1, keepdims=True)
    return (y - mean) * jax.lax.rsqrt(var + LN_EPS) * ln_gamma + ln_beta


if __name__ == "__main__":
    # Small shapes consistent with SimpleStem: img_size=16, patch_size=4,
    # in_chans=3, embed_dim=32, batch=2.
    B, C, H, W = 2, 3, 16, 16
    patch = 4
    E = 32

    key = jax.random.PRNGKey(0)
    kx, kw, kg, kb, km, kv, klg, klb = jax.random.split(key, 8)

    x = jax.random.normal(kx, (B, C, H, W), dtype=jnp.float32)

    # Deterministic synthetic parameters (no checkpoint load).
    conv_w = 0.1 * jax.random.normal(kw, (E, C, patch, patch), dtype=jnp.float32)
    bn_gamma = 1.0 + 0.1 * jax.random.normal(kg, (E,), dtype=jnp.float32)
    bn_beta = 0.1 * jax.random.normal(kb, (E,), dtype=jnp.float32)
    bn_mean = 0.1 * jax.random.normal(km, (E,), dtype=jnp.float32)
    bn_var = 1.0 + 0.1 * jnp.abs(jax.random.normal(kv, (E,), dtype=jnp.float32))
    ln_gamma = 1.0 + 0.1 * jax.random.normal(klg, (E,), dtype=jnp.float32)
    ln_beta = 0.1 * jax.random.normal(klb, (E,), dtype=jnp.float32)

    out = simple_stem_forward(x, conv_w, bn_gamma, bn_beta, bn_mean, bn_var,
                              ln_gamma, ln_beta, patch_size=patch)
    out = jax.block_until_ready(out)

    # Reference uses the same bf16-rounded operands as the kernel's MXU path
    # (bf16 products are exact in f32), so only accumulation order differs.
    xq = x.astype(jnp.bfloat16).astype(jnp.float32)
    wq = conv_w.astype(jnp.bfloat16).astype(jnp.float32)
    ref = _reference(xq, wq, bn_gamma, bn_beta, bn_mean, bn_var,
                     ln_gamma, ln_beta, patch)

    assert out.shape == (B, (H // patch) * (W // patch), E)
    assert jnp.allclose(out, ref, atol=2e-3, rtol=2e-3)
    print("KERNEL_OK")
</pallas_src>

<mosaic_0001>
module attributes {stable_mosaic.version = 11 : i64} {
  func.func @_stem_kernel(%arg0: i32, %arg1: memref<32x128xbf16, #tpu.memory_space<vmem>>, %arg2: memref<128x128xbf16, #tpu.memory_space<vmem>>, %arg3: memref<4x128xf32, #tpu.memory_space<vmem>>, %arg4: memref<32x128xf32, #tpu.memory_space<vmem>>) attributes {dimension_semantics = [#tpu.dimension_semantics<arbitrary>], iteration_bounds = array<i64: 1>, scalar_prefetch = 0 : i64, scratch_operands = 0 : i64, tpu.core_type = #tpu.core_type<tc>, window_params = [{transform_indices = @transform_0, window_bounds = array<i64: 32, 128>}, {pipeline_mode = #tpu.pipeline_mode<synchronous>, transform_indices = @transform_1, window_bounds = array<i64: 128, 128>}, {pipeline_mode = #tpu.pipeline_mode<synchronous>, transform_indices = @transform_2, window_bounds = array<i64: 4, 128>}, {transform_indices = @transform_3, window_bounds = array<i64: 32, 128>}]} {
    %c0 = arith.constant 0 : index
    %c0_0 = arith.constant 0 : index
    %0 = vector.load %arg1[%c0, %c0_0] : memref<32x128xbf16, #tpu.memory_space<vmem>>, vector<32x128xbf16>
    %c0_1 = arith.constant 0 : index
    %c0_2 = arith.constant 0 : index
    %1 = vector.load %arg2[%c0_1, %c0_2] : memref<128x128xbf16, #tpu.memory_space<vmem>>, vector<128x128xbf16>
    %cst = arith.constant dense<0.000000e+00> : vector<32x128xf32>
    %2 = tpu.matmul %0, %1, %cst {dimension_numbers = #tpu.dot_dimension_numbers<[1], [0], [0], [1], [0, 0, 1, 1], [], []>} : vector<32x128xbf16>, vector<128x128xbf16>, vector<32x128xf32> -> vector<32x128xf32>
    %c0_3 = arith.constant 0 : index
    %c0_4 = arith.constant 0 : index
    %3 = vector.load %arg3[%c0_3, %c0_4] : memref<4x128xf32, #tpu.memory_space<vmem>>, vector<4x128xf32>
    %4 = vector.extract_strided_slice %3 {offsets = [0, 0], sizes = [1, 128], strides = [1, 1]} : vector<4x128xf32> to vector<1x128xf32>
    %5 = vector.extract_strided_slice %3 {offsets = [1, 0], sizes = [1, 128], strides = [1, 1]} : vector<4x128xf32> to vector<1x128xf32>
    %6 = vector.extract_strided_slice %3 {offsets = [2, 0], sizes = [1, 128], strides = [1, 1]} : vector<4x128xf32> to vector<1x128xf32>
    %7 = vector.extract_strided_slice %3 {offsets = [3, 0], sizes = [1, 128], strides = [1, 1]} : vector<4x128xf32> to vector<1x128xf32>
    %8 = vector.broadcast %4 : vector<1x128xf32> to vector<32x128xf32>
    %9 = arith.mulf %2, %8 : vector<32x128xf32>
    %10 = vector.broadcast %5 : vector<1x128xf32> to vector<32x128xf32>
    %11 = arith.addf %9, %10 : vector<32x128xf32>
    %cst_5 = arith.constant 0.000000e+00 : f32
    %12 = vector.broadcast %cst_5 : f32 to vector<32x128xf32>
    %13 = arith.maximumf %11, %12 : vector<32x128xf32>
    %14 = tpu.iota {dimensions = array<i32: 1>} : vector<32x128xi32>
    %c32_i32 = arith.constant 32 : i32
    %15 = vector.broadcast %c32_i32 : i32 to vector<32x128xi32>
    %16 = arith.cmpi slt, %14, %15 : vector<32x128xi32>
    %cst_6 = arith.constant dense<0.000000e+00> : vector<32xf32>
    %17 = vector.multi_reduction <add>, %13, %cst_6 [1] : vector<32x128xf32> to vector<32xf32>
    %18 = vector.shape_cast %17 : vector<32xf32> to vector<32x1xf32>
    %cst_7 = arith.constant 3.125000e-02 : f32
    %19 = vector.broadcast %cst_7 : f32 to vector<32x1xf32>
    %20 = arith.mulf %18, %19 : vector<32x1xf32>
    %21 = vector.broadcast %20 : vector<32x1xf32> to vector<32x128xf32>
    %22 = arith.subf %13, %21 : vector<32x128xf32>
    %cst_8 = arith.constant 0.000000e+00 : f32
    %23 = vector.broadcast %cst_8 : f32 to vector<32x128xf32>
    %24 = arith.select %16, %22, %23 : vector<32x128xi1>, vector<32x128xf32>
    %25 = arith.mulf %24, %24 : vector<32x128xf32>
    %cst_9 = arith.constant dense<0.000000e+00> : vector<32xf32>
    %26 = vector.multi_reduction <add>, %25, %cst_9 [1] : vector<32x128xf32> to vector<32xf32>
    %27 = vector.shape_cast %26 : vector<32xf32> to vector<32x1xf32>
    %cst_10 = arith.constant 3.125000e-02 : f32
    %28 = vector.broadcast %cst_10 : f32 to vector<32x1xf32>
    %29 = arith.mulf %27, %28 : vector<32x1xf32>
    %cst_11 = arith.constant 9.99999974E-6 : f32
    %30 = vector.broadcast %cst_11 : f32 to vector<32x1xf32>
    %31 = arith.addf %29, %30 : vector<32x1xf32>
    %32 = math.rsqrt %31 : vector<32x1xf32>
    %33 = vector.broadcast %32 : vector<32x1xf32> to vector<32x128xf32>
    %34 = arith.mulf %24, %33 : vector<32x128xf32>
    %35 = vector.broadcast %6 : vector<1x128xf32> to vector<32x128xf32>
    %36 = arith.mulf %34, %35 : vector<32x128xf32>
    %37 = vector.broadcast %7 : vector<1x128xf32> to vector<32x128xf32>
    %38 = arith.addf %36, %37 : vector<32x128xf32>
    %c0_12 = arith.constant 0 : index
    %c0_13 = arith.constant 0 : index
    %39 = vector.load %arg4[%c0_12, %c0_13] : memref<32x128xf32, #tpu.memory_space<vmem>>, vector<32x128xf32>
    tpu.vector_store %arg4[%c0_12, %c0_13], %38 {strides = array<i32>} : memref<32x128xf32, #tpu.memory_space<vmem>>, vector<32x128xf32>,
    return
  }
  func.func @transform_0(%arg0: i32) -> (i32, i32) {
    %c0_i32 = arith.constant 0 : i32
    %c0_i32_0 = arith.constant 0 : i32
    return %arg0, %c0_i32 : i32, i32
  }
  func.func @transform_1(%arg0: i32) -> (i32, i32) {
    %c0_i32 = arith.constant 0 : i32
    %c0_i32_0 = arith.constant 0 : i32
    %c0_i32_1 = arith.constant 0 : i32
    return %c0_i32, %c0_i32_0 : i32, i32
  }
  func.func @transform_2(%arg0: i32) -> (i32, i32) {
    %c0_i32 = arith.constant 0 : i32
    %c0_i32_0 = arith.constant 0 : i32
    %c0_i32_1 = arith.constant 0 : i32
    return %c0_i32, %c0_i32_0 : i32, i32
  }
  func.func @transform_3(%arg0: i32) -> (i32, i32) {
    %c0_i32 = arith.constant 0 : i32
    %c0_i32_0 = arith.constant 0 : i32
    return %arg0, %c0_i32 : i32, i32
  }
}

</mosaic_0001>

<bundles_post_ra>
// kernel: simple_stem_forward.1
= control target key start
LH: loop header
LB: loop body
LE: loop exit
PB: predicated region body
PF: predicated region fallthrough
CT: control target
= control target key end

     0   :  { %s422_s0 = inlined_call_operand.vmem [shape: bf16[32,128], index: 0, kind: input, shape index: {}]   ;;  %s423_s1 = inlined_call_operand.vmem [shape: bf16[128,128], index: 1, kind: input, shape index: {}]   ;;  %s424_s2 = inlined_call_operand.vmem [shape: f32[4,128], index: 2, kind: input, shape index: {}]   ;;  %s425_s3 = inlined_call_operand.hbm [shape: f32[32,128], index: 3, kind: output, shape index: {}]  }
   0x1   :  { %v296_v0 = vld [vmem:[%s423_s1] sm:$0xff]   ;;  %v297_v1 = vld [vmem:[%s423_s1 + $0x8] sm:$0xff]   ;;  %v298_v2 = vld [vmem:[%s423_s1 + $0x10] sm:$0xff]  }
   0x2   :  { %273 = vmatprep.subr.bf16.mxu0 %v296_v0  ;;  %v299_v3 = vld [vmem:[%s423_s1 + $0x18] sm:$0xff]   ;;  %v304_v4 = vld [vmem:[%s422_s0] sm:$0xff]  }
   0x3   :  { %274 = vmatpush3.bf16.msra.mxu0 %v296_v0  ;;  %289 = vmatprep.mubr.bf16.mxu0 %v304_v4 }
   0x4   :  { %275 = vmatprep.subr.bf16.mxu0 %v297_v1 }
   0x7   :  { %276 = vmatpush3.bf16.msra.mxu0 %v297_v1 }
   0x8   :  { %277 = vmatprep.subr.bf16.mxu0 %v298_v2 }
   0x9   :  { %8 = vsyncpa [#allocation3], 0  ;;  %v300_v5 = vld [vmem:[%s423_s1 + $0x20] sm:$0xff]   ;;  %v301_v6 = vld [vmem:[%s423_s1 + $0x28] sm:$0xff]   ;;  %v146_v10 = vlaneseq }
   0xa   :  { %v302_v7 = vld [vmem:[%s423_s1 + $0x30] sm:$0xff]   ;;  %v303_v8 = vld [vmem:[%s423_s1 + $0x38] sm:$0xff]   ;;  %v305_v9 = vld [vmem:[%s422_s0 + $0x8] sm:$0xff]   ;;  %s338_s0 = smov [#allocation2]  }
   0xb   :  { %278 = vmatpush3.bf16.msra.mxu0 %v298_v2  ;;  %v147_v11 = vshrl.u32 %v146_v10, 7  ;;  %v145_v14 = vld [vmem:[%s424_s2] sm:$0xf]  ;;  %v167_v37 = vand.u32 127, %v146_v10  ;;  %s242_s1 = sshll.u32 %s338_s0, 4  ;;  %s243_s1 = int_to_ptr.vmem [resolvable:$true] %s242_s1 }
   0xc   :  { %279 = vmatprep.subr.bf16.mxu0 %v299_v3  ;;  %s314_s2 = scalar_lea.vmem %s243_s1, 512  ;;  %p319_p1 = scmp.lt.s32.totalorder %s243_s1, %s243_s1 }
   0xd   :  { %v219_v12 = vsub.s32 2, %v147_v11  ;;  %v227_v13 = vsub.s32 3, %v147_v11  ;;  %v148_v17 = vsub.s32 0, %v147_v11  ;;  %v156_v18 = vsub.s32 1, %v147_v11  ;;  %p315_p0 = scmp.ne.s32.totalorder %s243_s1, %s314_s2  ;;  %p320_p2 = scmp.lt.s32.totalorder %s314_s2, %s314_s2 }
   0xe   :  { %vm168_vm0 = vcmp.lt.s32.totalorder %v167_v37, 32 }
   0xf   :  { %280 = vmatpush3.bf16.msra.mxu0 %v299_v3  ;;  %v394_v15 = vrot.slane %v145_v14, %v219_v12  ;;  %v396_v16 = vrot.slane %v145_v14, %v227_v13  ;;  %v149_v19 = vrot.slane %v145_v14, %v148_v17  ;;  %v157_v20 = vrot.slane %v145_v14, %v156_v18  ;;  %p321_p3 = por %p320_p2, %p319_p1 }
  0x10   :  { %281 = vmatprep.subr.bf16.mxu0 %v300_v5 }
  0x11   :  { %p322_p4 = pnand %p321_p3, %p315_p0 }
  0x13   :  { %282 = vmatpush3.bf16.msra.mxu0 %v300_v5 }
  0x14   :  { %283 = vmatprep.subr.bf16.mxu0 %v301_v6 }
  0x17   :  { %284 = vmatpush3.bf16.msra.mxu0 %v301_v6 }
  0x18   :  { %285 = vmatprep.subr.bf16.mxu0 %v302_v7 }
  0x1b   :  { %286 = vmatpush3.bf16.msra.mxu0 %v302_v7 }
  0x1c   :  { %287 = vmatprep.subr.bf16.mxu0 %v303_v8 }
  0x1f   :  { %288 = vmatpush3.bf16.msra.mxu0 %v303_v8 }
  0x22   :  { %290 = vmatmul.mubr.bf16.vlgmr.msra.gmra.mrb[0].mxu0 %v305_v9 }
  0xf5   :  { %v291_v21 = vpop.f32.mrb[0].mxu0 }
  0xf6   :  { %v152_v22 = vmul.f32 %v291_v21, %v149_v19  ;;  %v130_v23 = vpop.f32.mrb[1].mxu0 }
  0xf7   :  { %v150_v24 = vmul.f32 %v149_v19, %v130_v23  ;;  %v292_v25 = vpop.f32.mrb[2].mxu0 }
  0xf8   :  { %v153_v26 = vmul.f32 %v292_v25, %v149_v19  ;;  %v133_v27 = vpop.f32.mrb[3].mxu0  ;;  %v160_v28 = vadd.f32 %v157_v20, %v152_v22 }
  0xf9   :  { %v151_v29 = vmul.f32 %v149_v19, %v133_v27  ;;  %v158_v30 = vadd.f32 %v157_v20, %v150_v24 }
  0xfa   :  { %v164_v31 = vmax.f32 %v160_v28, 0.0  ;;  %v161_v32 = vadd.f32 %v157_v20, %v153_v26 }
  0xfb   :  { %v162_v33 = vmax.f32 %v158_v30, 0.0  ;;  %v159_v34 = vadd.f32 %v157_v20, %v151_v29 }
  0xfc   :  { %173 = vadd.xlane.f32.xlu1 %v164_v31  ;;  %v165_v35 = vmax.f32 %v161_v32, 0.0 }
  0xfd   :  { %169 = vadd.xlane.f32.xlu0 %v162_v33  ;;  %v163_v36 = vmax.f32 %v159_v34, 0.0 }
 0x100   :  { %175 = vadd.xlane.f32.xlu1 %v165_v35 }
 0x101   :  { %171 = vadd.xlane.f32.xlu0 %v163_v36 }
 0x189   :  { %v174_v38 = vpop.xlane.xlu1 %173 }
 0x18a   :  { %v179_v39 = vmul.f32 0.03125, %v174_v38  ;;  %v170_v40 = vpop.xlane.xlu0 %169 }
 0x18b   :  { %v177_v41 = vmul.f32 0.03125, %v170_v40 }
 0x18c   :  { %v183_v42 = vsub.f32 %v164_v31, %v179_v39 }
 0x18d   :  { %v181_v43 = vsub.f32 %v162_v33, %v177_v41  ;;  %v176_v44 = vpop.xlane.xlu1 %175 }
 0x18e   :  { %v180_v45 = vmul.f32 0.03125, %v176_v44  ;;  %v172_v46 = vpop.xlane.xlu0 %171  ;;  %v187_v52 = vsel %vm168_vm0, %v183_v42, 0.0 }
 0x18f   :  { %v178_v47 = vmul.f32 0.03125, %v172_v46  ;;  %v185_v48 = vsel %vm168_vm0, %v181_v43, 0.0  ;;  %v191_v54 = vmul.f32 %v187_v52, %v187_v52 }
 0x190   :  { %v189_v49 = vmul.f32 %v185_v48, %v185_v48  ;;  %v184_v50 = vsub.f32 %v165_v35, %v180_v45 }
 0x191   :  { %v182_v51 = vsub.f32 %v163_v36, %v178_v47 }
 0x192   :  { %193 = vadd.xlane.f32.xlu0 %v189_v49  ;;  %v188_v56 = vsel %vm168_vm0, %v184_v50, 0.0 }
 0x193   :  { %v186_v53 = vsel %vm168_vm0, %v182_v51, 0.0  ;;  %v192_v57 = vmul.f32 %v188_v56, %v188_v56 }
 0x194   :  { %v190_v55 = vmul.f32 %v186_v53, %v186_v53 }
 0x196   :  { %197 = vadd.xlane.f32.xlu0 %v191_v54  ;;  %195 = vadd.xlane.f32.xlu1 %v190_v55 }
 0x19a   :  { %199 = vadd.xlane.f32.xlu1 %v192_v57 }
 0x21f   :  { %v194_v58 = vpop.xlane.xlu0 %193 }
 0x220   :  { %v201_v59 = vmul.f32 0.03125, %v194_v58 }
 0x222   :  { %v205_v60 = vadd.f32 1e-05, %v201_v59 }
 0x223   :  { %v196_v61 = vpop.xlane.xlu1 %195  ;;  %v198_v62 = vpop.xlane.xlu0 %197 }
 0x224   :  { %306 = vrsqrt.f32 %v205_v60  ;;  %v202_v63 = vmul.f32 0.03125, %v196_v61  ;;  %v203_v0 = vmul.f32 0.03125, %v198_v62 }
 0x226   :  { %v206_v1 = vadd.f32 1e-05, %v202_v63  ;;  %v207_v2 = vadd.f32 1e-05, %v203_v0 }
 0x227   :  { %v200_v3 = vpop.xlane.xlu1 %199 }
 0x228   :  { %308 = vrsqrt.f32 %v206_v1  ;;  %v204_v4 = vmul.f32 0.03125, %v200_v3 }
 0x229   :  { %310 = vrsqrt.f32 %v207_v2 }
 0x22a   :  { %v208_v5 = vadd.f32 1e-05, %v204_v4 }
 0x22c   :  { %312 = vrsqrt.f32 %v208_v5 }
 0x22e   :  { %v307_v6 = vpop.eup %306 }
 0x22f   :  { %v213_v7 = vmul.f32 %v307_v6, %v185_v48 }
 0x231   :  { %v221_v8 = vmul.f32 %v394_v15, %v213_v7 }
 0x232   :  { %v309_v9 = vpop.eup %308 }
 0x233   :  { %v311_v10 = vpop.eup %310  ;;  %v214_v11 = vmul.f32 %v309_v9, %v186_v53  ;;  %v229_v12 = vadd.f32 %v396_v16, %v221_v8 }
 0x234   :  { %v215_v13 = vmul.f32 %v311_v10, %v187_v52 }
 0x235   :  { %v222_v14 = vmul.f32 %v394_v15, %v214_v11  ;;  %233 = vst [vmem:[#allocation2] sm:$0xff] %v229_v12 }
 0x236   :  { %v313_v17 = vpop.eup %312  ;;  %v223_v18 = vmul.f32 %v394_v15, %v215_v13 }
 0x237   :  { %v216_v19 = vmul.f32 %v313_v17, %v188_v56  ;;  %v230_v20 = vadd.f32 %v396_v16, %v222_v14 }
 0x238   :  { %v231_v21 = vadd.f32 %v396_v16, %v223_v18 }
 0x239   :  { %v224_v22 = vmul.f32 %v394_v15, %v216_v19  ;;  %234 = vst [vmem:[#allocation2 + $0x8] sm:$0xff] %v230_v20 }
 0x23a   :  { %235 = vst [vmem:[#allocation2 + $0x10] sm:$0xff] %v231_v21 }
 0x23b   :  { %v232_v23 = vadd.f32 %v396_v16, %v224_v22 }
 0x23d   :  { %236 = vst [vmem:[#allocation2 + $0x18] sm:$0xff] %v232_v23 }
 0x23e   :  { %325 = shalt.err (!%p322_p4)
}
 0x23f   :  { %s326_s9 = scalar_lea.hbm %s425_s3, 512 }
 0x240   :  { %p327_p5 = scmp.ne.s32.totalorder %s425_s3, %s326_s9  ;;  %p330_p6 = scmp.lt.u32.totalorder %s326_s9, %s425_s3 }
 0x242   :  { %p332_p7 = pnand %p330_p6, %p327_p5 }
 0x244   :  { %335 = shalt.err (!%p332_p7)
}
 0x245   :  { %s339_s14 = smov 128   ;;  %s340_s15 = smov 8  }
 0x246   :  { %248 = dma.vmem_to_hbm [thread:$0]  %s243_s1, 512, %s425_s3, [#allocation3], %s339_s14, %s339_s14, %s340_s15  }
 0x247   :  { %336 = dma.done.wait [#allocation3], 512  }
 0x248   :  { %337 = vsyncadd [#allocation3], 4294966784 }
 0x249   :  { %252 = vsyncpa [#allocation3], 1 }

</bundles_post_ra>
